<compile_context>
chip_gen: v5e
topology: v5e:2x2
jax: 0.10.0
libtpu: 0.0.40
codegen_flags: <defaults>
</compile_context>

<pallas_src>
import jax
import jax.numpy as jnp
from jax.experimental import pallas as pl
from jax.experimental.pallas import tpu as pltpu


def _cross_attention_g_kernel(params_ref,          # SMEM (3,): [scale, 1-sigmoid(gating), h_temp]
                              x_ref, y_ref, w_ref, pos_ref,
                              out_ref, hmap_ref,
                              kt_ref):
    scale = params_ref[0]
    one_minus_sig = params_ref[1]
    h_temp = params_ref[2]

    # k^T = (scale * (y @ W^T))^T : computed once per batch block (query tile 0)
    # and kept resident in VMEM scratch across the "arbitrary" query-tile axis.
    # Stored transposed (TB, D, N) so the logits matmul below is a plain
    # (TQ, D) @ (D, N) -- the contraction dim is already on the RHS sublane
    # axis and no per-query-tile relayout of k is needed.
    @pl.when(pl.program_id(1) == 0)
    def _compute_kt():
        w = w_ref[...]                                               # (D, D), already W^T
        tb, n, d = y_ref.shape
        k = jnp.dot(y_ref[...].reshape(tb * n, d), w,
                    preferred_element_type=jnp.float32) * scale      # scale folded in once
        k = k.reshape(tb, n, d).astype(kt_ref.dtype)                 # cast first (cheaper transpose)
        for b in range(tb):                                          # tb is static & small
            kt_ref[b] = k[b].T                                       # (D, N)

    x = x_ref[...]                                                   # (TB, TQ, D) native dtype
    y = y_ref[...]                                                   # (TB, N,  D) native dtype
    kt = kt_ref[...]                                                 # (TB, D,  N) scaled keys

    # patch_score softmax with the gating folded into scalar factors:
    #   attn = (1 - sig) * softmax(logits) + sig * pos
    #        = p * ((1 - sig) * inv_denom) + pos_scaled
    logits = jnp.einsum('bqd,bdn->bqn', x, kt,
                        preferred_element_type=jnp.float32)          # (TB, TQ, N) f32
    m = jnp.max(logits, axis=-1, keepdims=True)
    p = jnp.exp(logits - m)
    inv = pl.reciprocal(jnp.sum(p, axis=-1, keepdims=True), approx=True)
    # pos_ref already carries sigmoid(gating); the add broadcasts over TB.
    attn = p * (one_minus_sig * inv) + pos_ref[...]                  # (TB, TQ, N) f32

    # out = attn @ y  (attn cast once; bf16 inputs keep a bf16 MXU path).
    attn_c = attn.astype(y.dtype)
    out = jnp.einsum('bqk,bkd->bqd', attn_c, y,
                     preferred_element_type=jnp.float32)             # (TB, TQ, D) f32
    out_ref[...] = out.astype(out_ref.dtype)

    # heat map = 2 * (1 - sigmoid(h_temp * entropy)); reuses the cast attn so
    # the log-heavy entropy runs in bf16 on bf16 inputs (v6e/v7x bf16 EUP),
    # exact f32 for f32 inputs; stored lane-dense (TB, 1, TQ).
    eps = jnp.asarray(1e-8, attn_c.dtype)
    neg_plogp = -attn_c * jnp.log(attn_c + eps)
    entropy = jnp.sum(neg_plogp.astype(jnp.float32), axis=-1)        # (TB, TQ) f32
    hmap = 2.0 * (1.0 - jax.nn.sigmoid(h_temp * entropy))
    hmap_ref[...] = hmap.reshape(hmap_ref.shape).astype(hmap_ref.dtype)


def _vmem_budget_bytes():
    """Generation-aware budget: ~3/4 of physical VMEM, capped at 96 MiB.

    v5e/v6e (128 MiB physical) -> ~96 MiB scoped limit / ~77 MiB tiling budget;
    v7x (64 MiB physical)      -> ~48 MiB scoped limit / ~38 MiB tiling budget.
    """
    try:
        cap = int(pltpu.get_tpu_info().vmem_capacity_bytes)
    except Exception:
        cap = 64 * 1024 * 1024               # assume the tightest chip (v7x)
    limit = min((cap * 3) // 4, 96 * 1024 * 1024)
    budget = (limit * 4) // 5                # headroom for padding / estimate error
    return limit, budget


def _choose_tiles(B, N, D, itemsize, budget):
    """Pick (TB, TQ) so one grid step's VMEM footprint stays within `budget`."""
    f32 = 4

    def est(tb, tq):
        single_batch_block = (tb == B)
        y_bufs = 1 if single_batch_block else 2   # Buffered(1) when grid-invariant
        v = 2 * tb * tq * D * itemsize            # x query tile (double-buffered)
        v += y_bufs * tb * N * D * itemsize       # y keys for the batch block
        v += 1 * D * D * itemsize                 # W^T (grid-invariant, Buffered(1))
        v += 2 * tq * N * f32                     # gated positional tile
        v += 2 * tb * tq * D * itemsize           # out tile
        v += 2 * tb * tq * itemsize               # heat-map tile
        v += tb * D * N * itemsize                # resident k^T scratch (single buffer)
        v += tb * N * D * f32                     # f32 k intermediate during per-block init
        v += 4 * tb * tq * N * f32                # live (TQ,N) f32 temps: logits, p, attn, p*log p
        return v

    # Keep at least two batch blocks when B >= 2 so the "parallel" batch axis
    # shards across both TensorCores on v7x (negligible cost on v5e/v6e).
    tb_max = max(1, B // 2)
    for tb in range(tb_max, 0, -1):
        if B % tb == 0 and est(tb, N) <= budget:
            return tb, N
    # Tile the query axis (TB = 1); TQ must be a multiple of 128 dividing N.
    for tq in (4096, 2048, 1024, 512, 256, 128):
        if tq < N and N % tq == 0 and est(1, tq) <= budget:
            return 1, tq
    # TODO(synk): add an online-softmax key-axis tiling path for huge N*D
    # instead of failing; fail loudly rather than spill / VMEM-OOM silently.
    raise ValueError(
        f"CrossAttention_G tile search failed: B={B}, N={N}, D={D} does not fit "
        f"the VMEM budget ({budget} bytes); key-axis tiling not implemented.")


def cross_attention_g(x, y, coords, qk_weight, pos_emb,
                      gating, h_temp, p_temp, scale):
    """Pallas implementation of CrossAttention_G.forward -> (attn @ y, heat_map)."""
    B, N, D = x.shape
    assert y.shape == (B, N, D)
    assert coords.shape == (N, N, 6)
    assert qk_weight.shape == (D, D)
    assert pos_emb.shape == (N, 6, 1)

    # --- Hoisted, batch-invariant pieces (computed once, outside the grid) ---
    # pos_score = softmax(-p_temp * (coords @ pos_emb).squeeze(-1), axis=-1)
    pos_logits = jnp.squeeze(jnp.matmul(coords.astype(jnp.float32),
                                        pos_emb.astype(jnp.float32)), -1)     # (N, N)
    pos_score = jax.nn.softmax(-jnp.asarray(p_temp, jnp.float32) * pos_logits,
                               axis=-1)                                       # (N, N) f32
    sig_g = jax.nn.sigmoid(jnp.asarray(gating, jnp.float32))
    pos_scaled = sig_g * pos_score                  # gating folded in once, outside the grid
    params = jnp.stack([jnp.asarray(scale, jnp.float32),
                        1.0 - sig_g,
                        jnp.asarray(h_temp, jnp.float32)])                    # SMEM scalars

    w_t = qk_weight.T                               # so k = y @ w_t inside the kernel

    itemsize = x.dtype.itemsize
    vmem_limit, budget = _vmem_budget_bytes()
    TB, TQ = _choose_tiles(B, N, D, itemsize, budget)
    grid = (B // TB, N // TQ)
    single_batch_block = (grid[0] == 1)

    # y is grid-invariant when there is a single batch block -> single-buffer it.
    if single_batch_block:
        y_spec = pl.BlockSpec((TB, N, D), lambda b, q, _p: (b, 0, 0),
                              pipeline_mode=pl.Buffered(1))
    else:
        y_spec = pl.BlockSpec((TB, N, D), lambda b, q, _p: (b, 0, 0))

    grid_spec = pltpu.PrefetchScalarGridSpec(
        num_scalar_prefetch=1,                      # params -> SMEM
        grid=grid,
        in_specs=[
            pl.BlockSpec((TB, TQ, D), lambda b, q, _p: (b, q, 0)),     # x (query tile)
            y_spec,                                                    # y (all keys)
            pl.BlockSpec((D, D), lambda b, q, _p: (0, 0),
                         pipeline_mode=pl.Buffered(1)),                # W^T (grid-invariant)
            pl.BlockSpec((TQ, N), lambda b, q, _p: (q, 0)),            # gated pos tile
        ],
        out_specs=[
            pl.BlockSpec((TB, TQ, D), lambda b, q, _p: (b, q, 0)),     # attn @ y
            pl.BlockSpec((TB, 1, TQ), lambda b, q, _p: (b, 0, q)),     # heat map (lane-dense)
        ],
        scratch_shapes=[pltpu.VMEM((TB, D, N), x.dtype)],              # resident k^T (scaled)
    )

    flops = 2 * B * N * D * D + 4 * B * N * N * D
    transcendentals = 2 * B * N * N + 2 * B * N
    bytes_accessed = ((x.size + y.size + w_t.size) * itemsize
                      + pos_scaled.size * 4
                      + B * N * D * itemsize + B * N * itemsize)

    out, hmap = pl.pallas_call(
        _cross_attention_g_kernel,
        out_shape=(jax.ShapeDtypeStruct((B, N, D), x.dtype),
                   jax.ShapeDtypeStruct((B, 1, N), x.dtype)),
        grid_spec=grid_spec,
        compiler_params=pltpu.CompilerParams(
            # Batch axis sharded across TensorCores (v7x megacore: _choose_tiles
            # guarantees >= 2 batch blocks when B >= 2); the query axis is
            # "arbitrary" because k^T scratch is carried across it.
            dimension_semantics=("parallel", "arbitrary"),
            vmem_limit_bytes=vmem_limit,
        ),
        cost_estimate=pl.CostEstimate(flops=flops,
                                      transcendentals=transcendentals,
                                      bytes_accessed=bytes_accessed),
    )(params, x, y, w_t, pos_scaled)

    return out, hmap.reshape(B, N, 1)


def _reference(x, y, coords, qk_weight, pos_emb, gating, h_temp, p_temp, scale):
    """Plain-JAX transcription of the PyTorch forward, for verification."""
    k = jnp.einsum('bnd,ed->bne', y, qk_weight)                      # y @ W^T
    patch = jax.nn.softmax(jnp.einsum('bnd,bmd->bnm', x, k) * scale, axis=-1)
    pos_logits = jnp.squeeze(jnp.matmul(coords, pos_emb), -1)        # (N, N)
    pos = jax.nn.softmax(-p_temp * pos_logits, axis=-1)
    sig = jax.nn.sigmoid(gating)
    attn = (1.0 - sig) * patch + sig * pos[None]
    out = attn @ y
    ent = jnp.sum(-attn * jnp.log(attn + 1e-8), axis=-1, keepdims=True)
    hmap = 2.0 * (1.0 - jax.nn.sigmoid(h_temp * ent))
    return out, hmap


if __name__ == "__main__":
    B, N, D = 2, 8, 32          # batch, num_patches, dim

    key = jax.random.PRNGKey(0)
    kx, ky, kc, kw, kp = jax.random.split(key, 5)

    x = jax.random.normal(kx, (B, N, D), jnp.float32)
    y = jax.random.normal(ky, (B, N, D), jnp.float32)
    coords = jax.random.normal(kc, (N, N, 6), jnp.float32)

    # Parameters (deterministic, mirroring __init__ / reset_parameters):
    bound = 1.0 / (D ** 0.5)
    qk_weight = jax.random.uniform(kw, (D, D), jnp.float32, -bound, bound)
    pos_emb = jax.random.truncated_normal(kp, 0.0, 1.0, (N, 6, 1), jnp.float32)
    gating = 1.0
    h_temp = 0.1
    p_temp = 1.0
    scale = D ** (-0.5)          # a_temp=False

    out, hmap = cross_attention_g(x, y, coords, qk_weight, pos_emb,
                                  gating, h_temp, p_temp, scale)
    jax.block_until_ready((out, hmap))

    ref_out, ref_hmap = _reference(x, y, coords, qk_weight, pos_emb,
                                   gating, h_temp, p_temp, scale)
    assert out.shape == (B, N, D) and hmap.shape == (B, N, 1)
    # Tolerance loosened slightly for the EUP approximate reciprocal in the
    # softmax (structural bugs would produce O(1) errors).
    assert jnp.allclose(out, ref_out, rtol=5e-3, atol=5e-3), "attn@y mismatch"
    assert jnp.allclose(hmap, ref_hmap, rtol=5e-3, atol=5e-3), "heat_map mismatch"

    print("KERNEL_OK")
</pallas_src>

<mosaic_0001>
module attributes {stable_mosaic.version = 11 : i64} {
  func.func @_cross_attention_g_kernel(%arg0: i32, %arg1: i32, %arg2: memref<3xf32, #tpu.memory_space<smem>>, %arg3: memref<1x8x32xf32, #tpu.memory_space<vmem>>, %arg4: memref<1x8x32xf32, #tpu.memory_space<vmem>>, %arg5: memref<32x32xf32, #tpu.memory_space<vmem>>, %arg6: memref<8x8xf32, #tpu.memory_space<vmem>>, %arg7: memref<1x8x32xf32, #tpu.memory_space<vmem>>, %arg8: memref<1x1x8xf32, #tpu.memory_space<vmem>>, %arg9: memref<1x32x8xf32, #tpu.memory_space<vmem>>) attributes {dimension_semantics = [#tpu.dimension_semantics<parallel>, #tpu.dimension_semantics<arbitrary>], iteration_bounds = array<i64: 2, 1>, scalar_prefetch = 1 : i64, scratch_operands = 1 : i64, tpu.core_type = #tpu.core_type<tc>, window_params = [{transform_indices = @transform_0, window_bounds = array<i64: 1, 8, 32>}, {transform_indices = @transform_1, window_bounds = array<i64: 1, 8, 32>}, {pipeline_mode = #tpu.pipeline_mode<synchronous>, transform_indices = @transform_2, window_bounds = array<i64: 32, 32>}, {transform_indices = @transform_3, window_bounds = array<i64: 8, 8>}, {transform_indices = @transform_4, window_bounds = array<i64: 1, 8, 32>}, {transform_indices = @transform_5, window_bounds = array<i64: 1, 1, 8>}]} {
    %c0 = arith.constant 0 : index
    %0 = memref.load %arg2[%c0] : memref<3xf32, #tpu.memory_space<smem>>
    %c1 = arith.constant 1 : index
    %1 = memref.load %arg2[%c1] : memref<3xf32, #tpu.memory_space<smem>>
    %c2 = arith.constant 2 : index
    %2 = memref.load %arg2[%c2] : memref<3xf32, #tpu.memory_space<smem>>
    %c0_i32 = arith.constant 0 : i32
    %3 = arith.cmpi eq, %arg1, %c0_i32 : i32
    %4 = arith.extui %3 : i1 to i32
    %c0_i32_0 = arith.constant 0 : i32
    %5 = arith.cmpi ne, %4, %c0_i32_0 : i32
    scf.if %5 {
      %c0_27 = arith.constant 0 : index
      %c0_28 = arith.constant 0 : index
      %47 = vector.load %arg5[%c0_27, %c0_28] : memref<32x32xf32, #tpu.memory_space<vmem>>, vector<32x32xf32>
      %c0_29 = arith.constant 0 : index
      %c0_30 = arith.constant 0 : index
      %c0_31 = arith.constant 0 : index
      %48 = vector.load %arg4[%c0_29, %c0_30, %c0_31] : memref<1x8x32xf32, #tpu.memory_space<vmem>>, vector<1x8x32xf32>
      %49 = vector.shape_cast %48 : vector<1x8x32xf32> to vector<8x32xf32>
      %cst_32 = arith.constant dense<0.000000e+00> : vector<8x32xf32>
      %50 = tpu.matmul %49, %47, %cst_32 {dimension_numbers = #tpu.dot_dimension_numbers<[1], [0], [0], [1], [0, 0, 1, 1], [], []>} : vector<8x32xf32>, vector<32x32xf32>, vector<8x32xf32> -> vector<8x32xf32>
      %51 = vector.broadcast %0 : f32 to vector<8x32xf32>
      %52 = arith.mulf %50, %51 : vector<8x32xf32>
      %53 = vector.shape_cast %52 : vector<8x32xf32> to vector<1x8x32xf32>
      %54 = vector.shape_cast %53 : vector<1x8x32xf32> to vector<8x32xf32>
      %55 = tpu.transpose %54, [1, 0] : vector<8x32xf32> -> vector<32x8xf32>
      %c0_33 = arith.constant 0 : index
      %c0_34 = arith.constant 0 : index
      %c0_35 = arith.constant 0 : index
      %56 = vector.load %arg9[%c0_33, %c0_34, %c0_35] : memref<1x32x8xf32, #tpu.memory_space<vmem>>, vector<1x32x8xf32>
      %57 = vector.shape_cast %56 : vector<1x32x8xf32> to vector<32x8xf32>
      %58 = vector.shape_cast %55 : vector<32x8xf32> to vector<1x32x8xf32>
      tpu.vector_store %arg9[%c0_33, %c0_34, %c0_35], %58 {strides = array<i32>} : memref<1x32x8xf32, #tpu.memory_space<vmem>>, vector<1x32x8xf32>,
    } else {
    }
    %c0_1 = arith.constant 0 : index
    %c0_2 = arith.constant 0 : index
    %c0_3 = arith.constant 0 : index
    %6 = vector.load %arg3[%c0_1, %c0_2, %c0_3] : memref<1x8x32xf32, #tpu.memory_space<vmem>>, vector<1x8x32xf32>
    %c0_4 = arith.constant 0 : index
    %c0_5 = arith.constant 0 : index
    %c0_6 = arith.constant 0 : index
    %7 = vector.load %arg4[%c0_4, %c0_5, %c0_6] : memref<1x8x32xf32, #tpu.memory_space<vmem>>, vector<1x8x32xf32>
    %c0_7 = arith.constant 0 : index
    %c0_8 = arith.constant 0 : index
    %c0_9 = arith.constant 0 : index
    %8 = vector.load %arg9[%c0_7, %c0_8, %c0_9] : memref<1x32x8xf32, #tpu.memory_space<vmem>>, vector<1x32x8xf32>
    "tpu.trace_start"() <{level = 10 : i32, message = "bqd,bdn->bqn"}> : () -> ()
    %cst = arith.constant dense<0.000000e+00> : vector<1x8x8xf32>
    %9 = tpu.matmul %6, %8, %cst {dimension_numbers = #tpu.dot_dimension_numbers<[2], [1], [1], [2], [0, 0, 0, 1, 1, 2], [0], [0]>} : vector<1x8x32xf32>, vector<1x32x8xf32>, vector<1x8x8xf32> -> vector<1x8x8xf32>
    "tpu.trace_stop"() : () -> ()
    %cst_10 = arith.constant dense<0xFF800000> : vector<1x8xf32>
    %10 = vector.multi_reduction <maximumf>, %9, %cst_10 [2] : vector<1x8x8xf32> to vector<1x8xf32>
    %11 = vector.shape_cast %10 : vector<1x8xf32> to vector<1x8x1xf32>
    %12 = vector.broadcast %11 : vector<1x8x1xf32> to vector<1x8x8xf32>
    %13 = arith.subf %9, %12 : vector<1x8x8xf32>
    %14 = math.exp %13 : vector<1x8x8xf32>
    %cst_11 = arith.constant dense<0.000000e+00> : vector<1x8xf32>
    %15 = vector.multi_reduction <add>, %14, %cst_11 [2] : vector<1x8x8xf32> to vector<1x8xf32>
    %16 = vector.shape_cast %15 : vector<1x8xf32> to vector<1x8x1xf32>
    %17 = tpu.reciprocal %16 {approx = true} : vector<1x8x1xf32> -> vector<1x8x1xf32>
    %18 = vector.broadcast %1 : f32 to vector<1x8x1xf32>
    %19 = arith.mulf %18, %17 : vector<1x8x1xf32>
    %20 = vector.broadcast %19 : vector<1x8x1xf32> to vector<1x8x8xf32>
    %21 = arith.mulf %14, %20 : vector<1x8x8xf32>
    %c0_12 = arith.constant 0 : index
    %c0_13 = arith.constant 0 : index
    %22 = vector.load %arg6[%c0_12, %c0_13] : memref<8x8xf32, #tpu.memory_space<vmem>>, vector<8x8xf32>
    %23 = vector.shape_cast %22 : vector<8x8xf32> to vector<1x8x8xf32>
    %24 = arith.addf %21, %23 : vector<1x8x8xf32>
    "tpu.trace_start"() <{level = 10 : i32, message = "bqk,bkd->bqd"}> : () -> ()
    %cst_14 = arith.constant dense<0.000000e+00> : vector<1x8x32xf32>
    %25 = tpu.matmul %24, %7, %cst_14 {dimension_numbers = #tpu.dot_dimension_numbers<[2], [1], [1], [2], [0, 0, 0, 1, 1, 2], [0], [0]>} : vector<1x8x8xf32>, vector<1x8x32xf32>, vector<1x8x32xf32> -> vector<1x8x32xf32>
    "tpu.trace_stop"() : () -> ()
    %c0_15 = arith.constant 0 : index
    %c0_16 = arith.constant 0 : index
    %c0_17 = arith.constant 0 : index
    %26 = vector.load %arg7[%c0_15, %c0_16, %c0_17] : memref<1x8x32xf32, #tpu.memory_space<vmem>>, vector<1x8x32xf32>
    tpu.vector_store %arg7[%c0_15, %c0_16, %c0_17], %25 {strides = array<i32>} : memref<1x8x32xf32, #tpu.memory_space<vmem>>, vector<1x8x32xf32>,
    %cst_18 = arith.constant 0.000000e+00 : f32
    %27 = vector.broadcast %cst_18 : f32 to vector<1x8x8xf32>
    %28 = arith.subf %27, %24 : vector<1x8x8xf32>
    %cst_19 = arith.constant 9.99999993E-9 : f32
    %29 = vector.broadcast %cst_19 : f32 to vector<1x8x8xf32>
    %30 = arith.addf %24, %29 : vector<1x8x8xf32>
    %31 = math.log %30 : vector<1x8x8xf32>
    %32 = arith.mulf %28, %31 : vector<1x8x8xf32>
    %cst_20 = arith.constant dense<0.000000e+00> : vector<1x8xf32>
    %33 = vector.multi_reduction <add>, %32, %cst_20 [2] : vector<1x8x8xf32> to vector<1x8xf32>
    %34 = vector.broadcast %2 : f32 to vector<1x8xf32>
    %35 = arith.mulf %34, %33 : vector<1x8xf32>
    %36 = arith.negf %35 : vector<1x8xf32>
    %37 = math.exp %36 : vector<1x8xf32>
    %cst_21 = arith.constant 1.000000e+00 : f32
    %38 = vector.broadcast %cst_21 : f32 to vector<1x8xf32>
    %39 = arith.addf %38, %37 : vector<1x8xf32>
    %40 = arith.divf %38, %39 : vector<1x8xf32>
    %cst_22 = arith.constant 1.000000e+00 : f32
    %41 = vector.broadcast %cst_22 : f32 to vector<1x8xf32>
    %42 = arith.subf %41, %40 : vector<1x8xf32>
    %cst_23 = arith.constant 2.000000e+00 : f32
    %43 = vector.broadcast %cst_23 : f32 to vector<1x8xf32>
    %44 = arith.mulf %43, %42 : vector<1x8xf32>
    %45 = vector.shape_cast %44 : vector<1x8xf32> to vector<1x1x8xf32>
    %c0_24 = arith.constant 0 : index
    %c0_25 = arith.constant 0 : index
    %c0_26 = arith.constant 0 : index
    %46 = vector.load %arg8[%c0_24, %c0_25, %c0_26] : memref<1x1x8xf32, #tpu.memory_space<vmem>>, vector<1x1x8xf32>
    tpu.vector_store %arg8[%c0_24, %c0_25, %c0_26], %45 {strides = array<i32>} : memref<1x1x8xf32, #tpu.memory_space<vmem>>, vector<1x1x8xf32>,
    return
  }
  func.func @transform_0(%arg0: i32, %arg1: i32, %arg2: memref<3xf32, #tpu.memory_space<smem>>) -> (i32, i32, i32) {
    %c0_i32 = arith.constant 0 : i32
    %c0_i32_0 = arith.constant 0 : i32
    return %arg0, %arg1, %c0_i32 : i32, i32, i32
  }
  func.func @transform_1(%arg0: i32, %arg1: i32, %arg2: memref<3xf32, #tpu.memory_space<smem>>) -> (i32, i32, i32) {
    %c0_i32 = arith.constant 0 : i32
    %c0_i32_0 = arith.constant 0 : i32
    %c0_i32_1 = arith.constant 0 : i32
    return %arg0, %c0_i32, %c0_i32_0 : i32, i32, i32
  }
  func.func @transform_2(%arg0: i32, %arg1: i32, %arg2: memref<3xf32, #tpu.memory_space<smem>>) -> (i32, i32) {
    %c0_i32 = arith.constant 0 : i32
    %c0_i32_0 = arith.constant 0 : i32
    %c0_i32_1 = arith.constant 0 : i32
    return %c0_i32, %c0_i32_0 : i32, i32
  }
  func.func @transform_3(%arg0: i32, %arg1: i32, %arg2: memref<3xf32, #tpu.memory_space<smem>>) -> (i32, i32) {
    %c0_i32 = arith.constant 0 : i32
    %c0_i32_0 = arith.constant 0 : i32
    return %arg1, %c0_i32 : i32, i32
  }
  func.func @transform_4(%arg0: i32, %arg1: i32, %arg2: memref<3xf32, #tpu.memory_space<smem>>) -> (i32, i32, i32) {
    %c0_i32 = arith.constant 0 : i32
    %c0_i32_0 = arith.constant 0 : i32
    return %arg0, %arg1, %c0_i32 : i32, i32, i32
  }
  func.func @transform_5(%arg0: i32, %arg1: i32, %arg2: memref<3xf32, #tpu.memory_space<smem>>) -> (i32, i32, i32) {
    %c0_i32 = arith.constant 0 : i32
    %c0_i32_0 = arith.constant 0 : i32
    return %arg0, %c0_i32, %arg1 : i32, i32, i32
  }
}

</mosaic_0001>

<bundles_post_ra>
// kernel: tpu_custom_call.1
= control target key start
LH: loop header
LB: loop body
LE: loop exit
PB: predicated region body
PF: predicated region fallthrough
CT: control target
= control target key end

     0   :  { %s1123_s24 = smov [#allocation4]   ;;  %s1359_s0 = inlined_call_operand.hbm [shape: f32[3], index: 0, kind: input, shape index: {}]   ;;  %s1360_s1 = inlined_call_operand.hbm [shape: f32[2,8,32], index: 1, kind: input, shape index: {}]   ;;  %s1361_s2 = inlined_call_operand.hbm [shape: f32[2,8,32], index: 2, kind: input, shape index: {}]   ;;  %s1362_s3 = inlined_call_operand.hbm [shape: f32[32,32], index: 3, kind: input, shape index: {}]   ;;  %s1363_s4 = inlined_call_operand.hbm [shape: f32[8,8], index: 4, kind: input, shape index: {}]   ;;  %s1364_s5 = inlined_call_operand.hbm [shape: f32[2,8,32], index: 5, kind: output, shape index: {0}]   ;;  %s1365_s6 = inlined_call_operand.hbm [shape: f32[2,1,8], index: 6, kind: output, shape index: {1}]  }
   0x1   :  { %1369 = sst [smem:[#allocation27_spill]] %s1362_s3  ;;  %s13_s23 = sshll.u32 %s1359_s0, 4  ;;  %s14_s23 = int_to_ptr.hbm [resolvable:$true] %s13_s23 }
   0x2   :  { %1370 = sst [smem:[#allocation28_spill]] %s1363_s4 }
   0x3   :  { %16 = dma.hbm_to_smem %s14_s23, 16, %s1123_s24, [#allocation3] }
   0x4   :  { %1073 = dma.done.wait [#allocation3], 16 }
   0x5   :  { %1074 = vsyncadd [#allocation3], 4294967280 }
   0x6   :  { %19 = sfence }
   0x7   :  { %20 = vsyncpa [#allocation6], 0 }
   0x8   :  { %22 = vsyncpa [#allocation6 + $0x1], 0 }
   0x9   :  { %23 = vsyncpa [#allocation9], 0 }
   0xa   :  { %25 = vsyncpa [#allocation9 + $0x1], 0 }
   0xb   :  { %26 = vsyncpa [#allocation12], 0 }
   0xc   :  { %27 = vsyncpa [#allocation7], 0 }
   0xd   :  { %29 = vsyncpa [#allocation7 + $0x1], 0 }
   0xe   :  { %30 = vsyncpa [#allocation15], 0 }
   0xf   :  { %32 = vsyncpa [#allocation15 + $0x1], 0  ;;  %s1166_s25 = smov 0   ;;  %s1168_s26 = smov 0  }
  0x10   :  { %s1170_s0 = smov 0   ;;  %s1172_s27 = smov 0  }
  0x11   :  { %s1174_s28 = smov 0   ;;  %s1176_s29 = smov 0  }
  0x12 LB: > { %1371 = sst [smem:[#allocation23_spill]] %s1109_s0  ;;  %s1197_s30 = sadd.s32 4294967295, %s1121_s29   ;;  %s1121_s29 = sphi %s1176_s29, %s38_s29   ;;  %s1117_s28 = sphi %s1174_s28, %s1385_s28   ;;  %s1113_s27 = sphi %s1172_s27, %s1384_s27   ;;  %s1109_s0 = sphi %s1170_s0, %s1383_s0   ;;  %s1105_s26 = sphi %s1168_s26, %s1387_s26   ;;  %s1101_s25 = sphi %s1166_s25, %s1386_s25  }
  0x13   : > { %1372 = sst [smem:[#allocation24_spill]] %s1117_s28  ;;  %p730_p0 = scmp.ge.s32.totalorder %s1121_s29, 1 }
  0x14   : > { %p73_p1 = scmp.eq.s32.totalorder %s1197_s30, 0  ;;  %p212_p2 = scmp.lt.s32.totalorder %s1121_s29, 3 }
  0x15   : > { %s1373_s3 = sld [smem:[#allocation27_spill]]  ;;  %s1124_s11 = smov [#allocation10]  }
  0x16   : > { %p1205_p3 = pnand %p730_p0, %p212_p2  ;;  %s225_s12 = sshll.u32 %s1124_s11, 4  ;;  %s226_s12 = int_to_ptr.vmem [resolvable:$true] %s225_s12 }
  0x17   : > { %p733_p6 = scmp.ge.s32.totalorder %s1121_s29, 2  ;;  %s1375_s4 = sld [smem:[#allocation28_spill]] }
  0x18   : > { %p770_p4 = pneg %p1205_p3  ;;  %s1125_s16 = smov 128  }
  0x19   : > { %s1126_s17 = smov 8   ;;  %s1127_s18 = smov [#allocation11]  }
  0x1a   : > { %p771_p5 = pnand %p770_p4, %p73_p1  ;;  %s242_s19 = sshll.u32 %s1127_s18, 4  ;;  %s243_s19 = int_to_ptr.vmem [resolvable:$true] %s242_s19 }
  0x1b   : > { %s223_s9 = sshll.u32 %s1373_s3, 4  ;;  %s729_s20 = sadd.s32 4294967294, %s1121_s29   ;;  %s224_s9 = int_to_ptr.hbm [resolvable:$true] %s223_s9 }
  0x1c   : > { %773 = dma.hbm_to_vmem [thread:$0]  (!%p771_p5), %s224_s9, 512, %s226_s12, [#allocation9], %s1125_s16, %s1125_s16, %s1126_s17  }
  0x1d   : > { %s240_s15 = sshll.u32 %s1375_s4, 4  ;;  %s50_s21 = sadd.s32 1, %s1117_s28  ;;  %s241_s15 = int_to_ptr.hbm [resolvable:$true] %s240_s15 }
  0x1e   : > { %776 = dma.hbm_to_vmem [thread:$0]  (!%p771_p5), %s241_s15, 128, %s243_s19, [#allocation12]  }
  0x1f   : > { %p52_p7 = scmp.ge.s32.totalorder %s50_s21, 2  ;;  %s59_s22 = sadd.s32 1, %s1109_s0 }
  0x20   : > { %p66_p8 = scmp.ne.s32.totalorder %s1109_s0, %s1105_s26  ;;  %p67_p9 = scmp.eq.s32.totalorder %s1121_s29, 0 }
  0x21   : > { %s1389_s21 = smov (%p52_p7, %s50_s21), 0  ;;  %p72_p11 = scmp.ne.s32.totalorder %s1105_s26, %s1101_s25 }
  0x22   : > { %1376 = sst [smem:[#allocation25_spill]] %s1389_s21  ;;  %p1225_p10 = por %p67_p9, %p66_p8 }
  0x23   : > { %s54_s24 = ssub.s32 %s1117_s28, %s1389_s21  ;;  %p171_p12 = scmp.eq.s32.totalorder %s1197_s30, 1 }
  0x24   : > { %p57_p13 = scmp.eq.s32.totalorder %s54_s24, 0  ;;  %p1236_p0 = por %p73_p1, %p72_p11 }
  0x25   : > { %p1240_p2 = por %p171_p12, %p66_p8  ;;  %p177_p4 = scmp.eq.s32.totalorder %s729_s20, 1 }
  0x26   : > { %s1245_s9 = scalar_select %p57_p13, %s1109_s0, %s59_s22  }
  0x27   : > { %p1247_p5 = por %p177_p4, %p72_p11  ;;  %p793_p7 = scmp.lt.s32.totalorder %s1121_s29, 2 }
  0x28   : > { %1380 = sst [smem:[#allocation26_spill]] %s1245_s9  ;;  %s253_s12 = sand.u32 1, %s1109_s0  }
  0x29   : > { %s735_s13 = sshll.u32 %s1117_s28, 3  ;;  %s734_s14 = sshll.u32 %s253_s12, 3 }
  0x2a   : > { %s262_s17 = scalar_lea.hbm %s1360_s1, %s735_s13  ;;  %s257_s19 = scalar_lea.vmem [#allocation5], %s734_s14 }
  0x2b   : > { %s264_s18 = sshll.u32 %s262_s17, 4  ;;  %s266_s24 = sshll.u32 %s257_s19, 4  ;;  %s265_s18 = int_to_ptr.hbm [resolvable:$true] %s264_s18  ;;  %s267_s24 = int_to_ptr.vmem [resolvable:$true] %s266_s24 }
  0x2c   : > { %p778_p8 = pnand %p793_p7, %p1225_p10  ;;  %s281_s3 = scalar_lea.hbm %s1361_s2, %s735_s13 }
  0x2d   : > { %s273_s4 = sand.u32 1, %s1121_s29   ;;  %s254_s21 = scalar_lea.sflag [#allocation6], %s253_s12 }
  0x2e   : > { %780 = dma.hbm_to_vmem [thread:$0]  (!%p778_p8), %s265_s18, 128, %s267_s24, %s254_s21  }
  0x2f   : > { %s283_s28 = sshll.u32 %s281_s3, 4  ;;  %s277_s9 = scalar_lea.vmem [#allocation8], %s734_s14  ;;  %s284_s28 = int_to_ptr.hbm [resolvable:$true] %s283_s28 }
  0x30   : > { %s285_s0 = sshll.u32 %s277_s9, 4  ;;  %s274_s15 = scalar_lea.sflag [#allocation9], %s273_s4  ;;  %s286_s0 = int_to_ptr.vmem [resolvable:$true] %s285_s0 }
  0x31   : > { %783 = dma.hbm_to_vmem [thread:$0]  (!%p778_p8), %s284_s28, 128, %s286_s0, %s274_s15  }
  0x32   : > { %294 = sbr.rel (%p1205_p3) target bundleno = 956 (0x3bc), region = 36  ;;  %s1266_s23 = sand.u32 (!%p1205_p3), 1, %s1105_s26  }
  0x33   : > { %s1269_s13 = sshll.u32 (!%p1205_p3), %s1266_s23, 3  ;;  %s297_s21 = scalar_lea.sflag (!%p1205_p3), [#allocation6], %s1266_s23 }
  0x34   : > { %s300_s3 = scalar_lea.vmem (!%p1205_p3), [#allocation5], %s1269_s13 }
  0x37   : > { %1076 = dma.done.wait (%p1236_p0), %s297_s21, 128  }
  0x38   : > { %1078 = vsyncadd (%p1236_p0), %s297_s21, 4294967168  ;;  %s306_s4 = sand.u32 1, %s1197_s30   ;;  %s310_s28 = scalar_lea.vmem [#allocation8], %s1269_s13 }
  0x39   : > { %s307_s0 = scalar_lea.sflag [#allocation9], %s306_s4 }
  0x3a   : > { %1080 = dma.done.wait (%p1236_p0), %s307_s0, 128  }
  0x3b   : > { %1082 = vsyncadd (%p1236_p0), %s307_s0, 4294967168 }
  0x3c   : > { %1084 = dma.done.wait (%p73_p1), [#allocation9], 512  }
  0x3d   : > { %1086 = vsyncadd (%p73_p1), [#allocation9], 4294966784 }
  0x3e   : > { %1088 = dma.done.wait (%p73_p1), [#allocation12], 128  }
  0x3f   : > { %1090 = vsyncadd (%p73_p1), [#allocation12], 4294967168  ;;  %v367_v0 = vld [vmem:[#allocation10 + $0x18] sm:$0xff]  ;;  %v366_v1 = vld [vmem:[#allocation10 + $0x10] sm:$0xff]  ;;  %vm369_vm0 = vcmask 261120   ;;  %s357_s10 = sld [smem:[#allocation4]] }
  0x40   : > { %385 = vmatpush.msra.mxu0 %v367_v0  ;;  %v368_v2 = vld [vmem:[%s310_s28] sm:$0xff]  ;;  %v365_v3 = vld [vmem:[#allocation10 + $0x8] sm:$0xff]  ;;  %v364_v4 = vld [vmem:[#allocation10] sm:$0xff]  ;;  %vm427_vm1 = vcmask 64512   ;;  %s744_s30 = sld [smem:[#allocation4 + $0x1]]  ;;  %s751_s9 = sshll.u32 %s1113_s27, 3 }
  0x41   : > { %496 = vmatpush.msra.mxu2 %v368_v2  ;;  %v432_v15 = vld [vmem:[%s300_s3] sm:$0xff]  ;;  %s745_s7 = sld [smem:[#allocation4 + $0x2]]  ;;  %s556_s16 = scalar_lea.hbm %s1364_s5, %s751_s9 }
  0x42   : > { %386 = vmatpush.msra.mxu0 %v366_v1  ;;  %v476_v28 = vld [vmem:[#allocation11] sm:$0xff]  ;;  %s350_s17 = scalar_lea.vmem [#allocation13], %s1269_s13  ;;  %s560_s19 = sshll.u32 %s556_s16, 4  ;;  %s561_s19 = int_to_ptr.hbm [resolvable:$true] %s560_s19 }
  0x43   : > { %s558_s18 = sshll.u32 %s350_s17, 4  ;;  %s541_s24 = scalar_lea.sflag [#allocation7], %s1266_s23  ;;  %s559_s18 = int_to_ptr.vmem [resolvable:$true] %s558_s18 }
  0x44   : > { %387 = vmatpush.msra.mxu0 %v365_v3  ;;  %s1007_s20 = sshra.s32 %s561_s19, 4  ;;  %s1013_s21 = scalar_lea.hbm %s1364_s5, 16  ;;  %s1008_s20 = int_to_ptr.hbm [resolvable:$true] %s1007_s20 }
  0x45   : > { %v393_v5 = vstv %s357_s10  ;;  %s1009_s22 = scalar_lea.hbm %s1008_s20, 8  ;;  %p1014_p10 = scmp.lt.s32.totalorder %s1008_s20, %s1364_s5 }
  0x46   : > { %388 = vmatpush.msra.mxu0 %v364_v4  ;;  %v473_v25 = vstv %s744_s30  ;;  %p1010_p1 = scmp.ne.s32.totalorder %s1008_s20, %s1009_s22  ;;  %p1015_p11 = scmp.lt.s32.totalorder %s1013_s21, %s1009_s22 }
  0x47   : > { %746 = vmatmul.msk.f32.vlgmr.msra.gmra.mxu0 %vm369_vm0, %v368_v2  ;;  %v510_v37 = vstv %s745_s7 }
  0x48   : > { %p1011_p3 = pnand %p1010_p1, %p1240_p2  ;;  %p1016_p12 = por %p1015_p11, %p1014_p10 }
  0x4a   : > { %p1012_p9 = pneg %p1011_p3 }
  0x4c   : > { %p1017_p13 = pnand %p1016_p12, %p1012_p9 }
  0xc4   : > { %v390_v6 = vpop.f32.mrf.mxu0 }
  0xc5   : > { %v394_v7 = vmul.f32 %v393_v5, %v390_v6 }
  0xc7   : > { %395 = vxpose.xlu0.b32.start.end [1/1] (short) (narrow) %v394_v7, 32 }
 0x16b   : > { %v411_v8 = vpop.trf.xlu0 }
 0x16c   : > { %428 = vst.msk [vmem:[#allocation2] sm:$0xff] %vm427_vm1, %v411_v8 }
 0x173   : > { %v412_v9 = vpop.trf.xlu0  ;;  %v434_v16 = vld [vmem:[#allocation2] sm:$0xff] }
 0x174   : > { %429 = vst.msk [vmem:[#allocation2 + $0x8] sm:$0xff] %vm427_vm1, %v412_v9 }
 0x17b   : > { %v413_v10 = vpop.trf.xlu0  ;;  %v435_v14 = vld [vmem:[#allocation2 + $0x8] sm:$0xff] }
 0x17c   : > { %430 = vst.msk [vmem:[#allocation2 + $0x10] sm:$0xff] %vm427_vm1, %v413_v10 }
 0x183   : > { %v414_v11 = vpop.trf.xlu0  ;;  %v436_v13 = vld [vmem:[#allocation2 + $0x10] sm:$0xff] }
 0x184   : > { %431 = vst.msk [vmem:[#allocation2 + $0x18] sm:$0xff] %vm427_vm1, %v414_v11 }
 0x18b   : > { %v437_v12 = vld [vmem:[#allocation2 + $0x18] sm:$0xff] }
 0x18c   : > { %454 = vmatpush.msra.mxu1 %v437_v12 }
 0x18e   : > { %455 = vmatpush.msra.mxu1 %v436_v13 }
 0x190   : > { %456 = vmatpush.msra.mxu1 %v435_v14 }
 0x192   : > { %457 = vmatpush.msra.mxu1 %v434_v16 }
 0x193   : > { %747 = vmatmul.msk.f32.vlgmr.msra.gmra.mxu1 %vm369_vm0, %v432_v15 }
 0x210   : > { %v459_v17 = vpop.f32.mrf.mxu1 }
 0x211   : > { %v463_v18 = vsel %vm427_vm1, %v459_v17, -inf }
 0x212   : > { %464 = vmax.xlane.f32.xlu0 %v463_v18 }
 0x285   : > { %v465_v19 = vpop.xlane.xlu0 %464 }
 0x286   : > { %v466_v20 = vsub.f32 %v459_v17, %v465_v19 }
 0x288   : > { %v467_v21 = vmul.f32 1.442695, %v466_v20 }
 0x28a   : > { %851 = vpow2.f32 %v467_v21 }
 0x290   : > { %v852_v22 = vpop.eup %851 }
 0x291   : > { %v469_v23 = vsel %vm427_vm1, %v852_v22, 0.0 }
 0x292   : > { %470 = vadd.xlane.f32.xlu1 %v469_v23 }
 0x305   : > { %v471_v24 = vpop.xlane.xlu1 %470 }
 0x306   : > { %853 = vrcp.f32 %v471_v24 }
 0x30c   : > { %v854_v26 = vpop.eup %853 }
 0x30d   : > { %v474_v27 = vmul.f32 %v854_v26, %v473_v25 }
 0x30f   : > { %v475_v29 = vmul.f32 %v852_v22, %v474_v27 }
 0x311   : > { %v477_v30 = vadd.f32 %v476_v28, %v475_v29 }
 0x313   : > { %748 = vmatmul.msk.f32.vlgmr.msra.gmra.mxu2 %vm427_vm1, %v477_v30  ;;  %v503_v31 = vadd.f32 1e-08, %v477_v30  ;;  %v502_v33 = vsub.f32 0.0, %v477_v30 }
 0x315   : > { %855 = vlog2.f32 %v503_v31 }
 0x31b   : > { %v856_v32 = vpop.eup %855 }
 0x31c   : > { %v505_v34 = vmul.f32 0.6931472, %v856_v32 }
 0x31e   : > { %v506_v35 = vmul.f32 %v505_v34, %v502_v33 }
 0x320   : > { %v507_v36 = vsel %vm427_vm1, %v506_v35, 0.0 }
 0x321   : > { %508 = vadd.xlane.f32.xlu1 %v507_v36 }
 0x394   : > { %v509_v38 = vpop.xlane.xlu1 %508 }
 0x395   : > { %v511_v39 = vmul.f32 %v510_v37, %v509_v38 }
 0x396   : > { %v498_v40 = vpop.f32.mrf.mxu2 }
 0x397   : > { %v749_v41 = vmul.f32 -1.442695, %v511_v39  ;;  %501 = vst.msk [vmem:[%s350_s17] sm:$0xff] %vm369_vm0, %v498_v40 }
 0x398   : > { %1020 = shalt.err (!%p1017_p13)
}
 0x399   : > { %766 = dma.vmem_to_hbm [thread:$0]  (%p1240_p2), %s559_s18, 128, %s561_s19, %s541_s24   ;;  %857 = vpow2.f32 %v749_v41  ;;  %v534_v51 = vlaneseq  ;;  %vm538_vm6 = vcmask 57344  }
 0x39a   : > { %s570_s10 = scalar_lea.hbm %s1365_s6, %s1113_s27  ;;  %s356_s30 = scalar_lea.vmem [#allocation14], %s1266_s23 }
 0x39b   : > { %v535_v56 = vand.u32 127, %v534_v51  ;;  %s572_s7 = sshll.u32 %s356_s30, 4  ;;  %s574_s9 = sshll.u32 %s570_s10, 4  ;;  %s573_s7 = int_to_ptr.vmem [resolvable:$true] %s572_s7  ;;  %s575_s9 = int_to_ptr.hbm [resolvable:$true] %s574_s9 }
 0x39c   : > { %s546_s12 = scalar_lea.sflag [#allocation15], %s1266_s23  ;;  %s1035_s14 = sshra.s32 %s575_s9, 4  ;;  %s1036_s14 = int_to_ptr.hbm [resolvable:$true] %s1035_s14 }
 0x39d   : > { %s1037_s16 = scalar_lea.hbm %s1036_s14, 1  ;;  %s1041_s18 = scalar_lea.hbm %s1365_s6, 2 }
 0x39e   : > { %p1038_p0 = scmp.ne.s32.totalorder %s1036_s14, %s1037_s16  ;;  %p1042_p8 = scmp.lt.s32.totalorder %s1036_s14, %s1365_s6 }
 0x39f   : > { %v858_v42 = vpop.eup %857  ;;  %p1043_p1 = scmp.lt.s32.totalorder %s1041_s18, %s1037_s16 }
 0x3a0   : > { %v515_v43 = vadd.f32 1.0, %v858_v42  ;;  %p1039_p4 = pnand %p1038_p0, %p1240_p2 }
 0x3a1   : > { %p1044_p3 = por %p1043_p1, %p1042_p8 }
 0x3a2   : > { %859 = vrcp.f32 %v515_v43  ;;  %v527_v47 = vand.u32 2147483648, %v515_v43  ;;  %v525_v49 = vand.u32 2147483647, %v515_v43  ;;  %vm521_vm3 = vweird.f32 %v515_v43  ;;  %p1040_p7 = pneg %p1039_p4 }
 0x3a4   : > { %v528_v52 = vor.u32 1.1754944e-38, %v527_v47  ;;  %vm526_vm5 = vcmp.eq.f32.partialorder %v525_v49, 8.507059e+37  ;;  %p1045_p9 = pnand %p1044_p3, %p1040_p7 }
 0x3a8   : > { %v860_v44 = vpop.eup %859 }
 0x3a9   : > { %v517_v45 = vmul.f32 %v860_v44, %v515_v43  ;;  %vm522_vm2 = vweird.f32 %v860_v44 }
 0x3aa   : > { %vm523_vm4 = vmor %vm521_vm3, %vm522_vm2 }
 0x3ab   : > { %v518_v46 = vsub.f32 1.0, %v517_v45 }
 0x3ad   : > { %v519_v48 = vmul.f32 %v860_v44, %v518_v46 }
 0x3af   : > { %v520_v50 = vadd.f32 %v860_v44, %v519_v48 }
 0x3b1   : > { %v524_v53 = vsel %vm523_vm4, %v860_v44, %v520_v50 }
 0x3b2   : > { %v529_v54 = vsel %vm526_vm5, %v528_v52, %v524_v53 }
 0x3b3   : > { %v531_v55 = vsub.f32 1.0, %v529_v54 }
 0x3b5   : > { %v532_v57 = vmul.f32 2.0, %v531_v55 }
 0x3b7   : > { %v536_v58 = vperm.slane %v532_v57, %v535_v56 }
 0x3b9   : > { %539 = vst.msk [vmem:[%s356_s30] sm:$0x1] %vm538_vm6, %v536_v58 }
 0x3ba   : > { %1048 = shalt.err (!%p1045_p9)
}
 0x3bb   : > { %767 = dma.vmem_to_hbm [thread:$0]  (%p1240_p2), %s573_s7, 16, %s575_s9, %s546_s12  }
 0x3bc PF: > { %s586_s23 = sand.u32 1, %s1101_s25   ;;  %p785_p10 = pnand %p733_p6, %p1247_p5 }
 0x3bd   : > { %s587_s20 = scalar_lea.sflag [#allocation7], %s586_s23 }
 0x3be   : > { %p786_p11 = pneg %p785_p10 }
 0x3c0   : > { %1092 = dma.done.wait (%p786_p11), %s587_s20, 128  }
 0x3c1   : > { %1094 = vsyncadd (%p786_p11), %s587_s20, 4294967168  ;;  %s597_s22 = scalar_lea.sflag [#allocation15], %s586_s23 }
 0x3c2   : > { %1096 = dma.done.wait (%p786_p11), %s597_s22, 16  }
 0x3c3   : > { %1098 = vsyncadd (%p786_p11), %s597_s22, 4294967280  ;;  %s38_s29 = sadd.s32 1, %s1121_s29   ;;  %s1382_s8 = sld [smem:[#allocation23_spill]] }
 0x3c4   : > { %p35_p12 = scmp.ge.s32.totalorder %s38_s29, 4   ;;  %s1383_s0 = sld [smem:[#allocation26_spill]] }
 0x3c5   : > { %s1384_s27 = sld [smem:[#allocation24_spill]]  ;;  %s1386_s25 = smov %s1105_s26 }
 0x3c6   : > { %s1385_s28 = sld [smem:[#allocation25_spill]]  ;;  %37 = sbr.rel (!%p35_p12) target bundleno = 18 (0x12), region = 124 }
 0x3c9   : > { %s1387_s26 = smov %s1382_s8 }
 0x3cb   :  { %602 = vsyncpa [#allocation6], 1 }
 0x3cc   :  { %604 = vsyncpa [#allocation6 + $0x1], 1 }
 0x3cd   :  { %605 = vsyncpa [#allocation9], 1 }
 0x3ce   :  { %607 = vsyncpa [#allocation9 + $0x1], 1 }
 0x3cf   :  { %608 = vsyncpa [#allocation12], 1 }
 0x3d0   :  { %609 = vsyncpa [#allocation7], 1 }
 0x3d1   :  { %611 = vsyncpa [#allocation7 + $0x1], 1 }
 0x3d2   :  { %612 = vsyncpa [#allocation15], 1 }
 0x3d3   :  { %614 = vsyncpa [#allocation15 + $0x1], 1 }

</bundles_post_ra>
